<compile_context>
chip_gen: v6e
topology: v6e:2x2x1
jax: 0.10.0
libtpu: 0.0.40
codegen_flags: <defaults>
</compile_context>

<pallas_src>
import math
import functools

import jax
import jax.numpy as jnp
from jax import lax
from jax.experimental import pallas as pl
from jax.experimental.pallas import tpu as pltpu


# ----------------------------------------------------------------------------
# Fused encoder-layer kernel (one batch element per grid step)
# ----------------------------------------------------------------------------

def _encoder_layer_kernel(x_ref,
                          wqkv_ref, bqkv_ref,          # packed in-proj
                          wo_ref, bo_ref,              # attention out-proj
                          wc_attn_ref, wc_q_ref, bc_ref,   # cat-linear split in two
                          g1_ref, b1n_ref,             # LayerNorm1
                          w1_ref, b1_ref,              # FFN linear1
                          w2_ref, b2_ref,              # FFN linear2
                          g2_ref, b2n_ref,             # LayerNorm2
                          o_ref,
                          *, nhead, scale, eps):
    x = x_ref[0]                                   # (S, D) for this batch element
    S, D = x.shape
    hd = D // nhead

    # ---- packed QKV projection: one MXU matmul, pre-transposed weights (no .T) ----
    qkv = (jnp.dot(x, wqkv_ref[...], preferred_element_type=jnp.float32)
           + bqkv_ref[...])                        # (S, 3D)
    q = qkv[:, :D] * scale
    k = qkv[:, D:2 * D]
    v = qkv[:, 2 * D:]

    # ---- per-head scaled dot-product attention (static, unrolled head loop) ----
    ctx_heads = []
    for h in range(nhead):
        lo, hi = h * hd, (h + 1) * hd
        qh = q[:, lo:hi]                           # (S, hd)
        kh = k[:, lo:hi]
        vh = v[:, lo:hi]
        # scores = qh @ kh^T via dot_general contracting last axes (no transpose)
        s = lax.dot_general(qh, kh, (((1,), (1,)), ((), ())),
                            preferred_element_type=jnp.float32)   # (S, S)
        m = jnp.max(s, axis=-1, keepdims=True)
        e = jnp.exp(s - m)
        p = e * pl.reciprocal(jnp.sum(e, axis=-1, keepdims=True), approx=True)
        ctx_heads.append(jnp.dot(p, vh, preferred_element_type=jnp.float32))
    ctx = jnp.concatenate(ctx_heads, axis=-1)      # (S, D)

    attn = (jnp.dot(ctx, wo_ref[...], preferred_element_type=jnp.float32)
            + bo_ref[...])

    # ---- cat([attn, query]) @ Wc  ==  attn @ Wc1 + query @ Wc2  (no concat) ----
    y = (jnp.dot(attn, wc_attn_ref[...], preferred_element_type=jnp.float32)
         + jnp.dot(x, wc_q_ref[...], preferred_element_type=jnp.float32)
         + bc_ref[...])

    # ---- residual + LayerNorm1 (fused epilogue) ----
    y = x + y
    mu = jnp.mean(y, axis=-1, keepdims=True)
    var = jnp.mean((y - mu) ** 2, axis=-1, keepdims=True)
    y = (y - mu) * lax.rsqrt(var + eps) * g1_ref[...] + b1n_ref[...]

    # ---- feed-forward: linear1 -> relu -> linear2 ----
    hff = jnp.dot(y, w1_ref[...], preferred_element_type=jnp.float32) + b1_ref[...]
    hff = jnp.maximum(hff, 0.0)
    ff = jnp.dot(hff, w2_ref[...], preferred_element_type=jnp.float32) + b2_ref[...]

    # ---- residual + LayerNorm2 ----
    z = y + ff
    mu2 = jnp.mean(z, axis=-1, keepdims=True)
    var2 = jnp.mean((z - mu2) ** 2, axis=-1, keepdims=True)
    z = (z - mu2) * lax.rsqrt(var2 + eps) * g2_ref[...] + b2n_ref[...]

    o_ref[0] = z.astype(o_ref.dtype)


# ----------------------------------------------------------------------------
# Wrapper
# ----------------------------------------------------------------------------

def transformer_encoder_layer(src, packed, nhead):
    """TransformerEncoderLayer.forward (eval mode, no masks).

    src: (S, B, D)  ->  (S, B, D)
    """
    S, B, D = src.shape
    Dff = packed["w1_t"].shape[1]
    hd = D // nhead

    x = jnp.transpose(src, (1, 0, 2))              # (B, S, D): one relayout, once

    kern = functools.partial(_encoder_layer_kernel, nhead=nhead,
                             scale=1.0 / math.sqrt(hd), eps=1e-5)

    def full(shape):
        return pl.BlockSpec(shape, lambda b: (0, 0))

    out = pl.pallas_call(
        kern,
        out_shape=jax.ShapeDtypeStruct((B, S, D), src.dtype),
        grid=(B,),
        in_specs=[
            pl.BlockSpec((1, S, D), lambda b: (b, 0, 0)),     # x (per-batch tile)
            full((D, 3 * D)), full((1, 3 * D)),               # wqkv_t, bqkv
            full((D, D)), full((1, D)),                       # wo_t, bo
            full((D, D)), full((D, D)), full((1, D)),         # wc_attn_t, wc_q_t, bc
            full((1, D)), full((1, D)),                       # ln1 gamma/beta
            full((D, Dff)), full((1, Dff)),                   # w1_t, b1
            full((Dff, D)), full((1, D)),                     # w2_t, b2
            full((1, D)), full((1, D)),                       # ln2 gamma/beta
        ],
        out_specs=pl.BlockSpec((1, S, D), lambda b: (b, 0, 0)),
        compiler_params=pltpu.CompilerParams(
            dimension_semantics=("parallel",)),
    )(x,
      packed["wqkv_t"], packed["bqkv"],
      packed["wo_t"], packed["bo"],
      packed["wc_attn_t"], packed["wc_q_t"], packed["bc"],
      packed["ln1_g"], packed["ln1_b"],
      packed["w1_t"], packed["b1"],
      packed["w2_t"], packed["b2"],
      packed["ln2_g"], packed["ln2_b"])

    return jnp.transpose(out, (1, 0, 2))           # back to (S, B, D)


# ----------------------------------------------------------------------------
# Parameters (PyTorch layout) + one-time packing / pre-transposition
# ----------------------------------------------------------------------------

def init_params(key, d_model, dim_feedforward):
    ks = jax.random.split(key, 5)
    s = 0.05
    D, F = d_model, dim_feedforward
    return {
        # nn.MultiheadAttention packed in_proj: (3D, D), bias (3D,)
        "in_proj_w": jax.random.normal(ks[0], (3 * D, D), jnp.float32) * s,
        "in_proj_b": jnp.zeros((3 * D,), jnp.float32),
        "out_proj_w": jax.random.normal(ks[1], (D, D), jnp.float32) * s,
        "out_proj_b": jnp.zeros((D,), jnp.float32),
        # MultiheadAttentionCat.linear: (D, 2D)
        "cat_w": jax.random.normal(ks[2], (D, 2 * D), jnp.float32) * s,
        "cat_b": jnp.zeros((D,), jnp.float32),
        # feed-forward
        "w1": jax.random.normal(ks[3], (F, D), jnp.float32) * s,
        "b1": jnp.zeros((F,), jnp.float32),
        "w2": jax.random.normal(ks[4], (D, F), jnp.float32) * s,
        "b2": jnp.zeros((D,), jnp.float32),
        # layer norms
        "ln1_g": jnp.ones((D,), jnp.float32),
        "ln1_b": jnp.zeros((D,), jnp.float32),
        "ln2_g": jnp.ones((D,), jnp.float32),
        "ln2_b": jnp.zeros((D,), jnp.float32),
    }


def pack_params(p):
    """Pre-transpose weights to (Din, Dout) once; split the cat-linear weight."""
    D = p["out_proj_w"].shape[0]
    return {
        "wqkv_t":    jnp.transpose(p["in_proj_w"]),           # (D, 3D)
        "bqkv":      p["in_proj_b"].reshape(1, -1),
        "wo_t":      jnp.transpose(p["out_proj_w"]),          # (D, D)
        "bo":        p["out_proj_b"].reshape(1, -1),
        "wc_attn_t": jnp.transpose(p["cat_w"][:, :D]),        # multiplies attn_out
        "wc_q_t":    jnp.transpose(p["cat_w"][:, D:]),        # multiplies query
        "bc":        p["cat_b"].reshape(1, -1),
        "ln1_g":     p["ln1_g"].reshape(1, -1),
        "ln1_b":     p["ln1_b"].reshape(1, -1),
        "w1_t":      jnp.transpose(p["w1"]),                  # (D, Dff)
        "b1":        p["b1"].reshape(1, -1),
        "w2_t":      jnp.transpose(p["w2"]),                  # (Dff, D)
        "b2":        p["b2"].reshape(1, -1),
        "ln2_g":     p["ln2_g"].reshape(1, -1),
        "ln2_b":     p["ln2_b"].reshape(1, -1),
    }


# ----------------------------------------------------------------------------
# Main
# ----------------------------------------------------------------------------

if __name__ == "__main__":
    d_model, nhead, dim_feedforward = 32, 4, 64
    S, B = 8, 2   # sequence length, batch

    key = jax.random.PRNGKey(0)
    k_src, k_par = jax.random.split(key, 2)
    src = jax.random.normal(k_src, (S, B, d_model), jnp.float32)
    params = pack_params(init_params(k_par, d_model, dim_feedforward))

    fwd = jax.jit(functools.partial(transformer_encoder_layer, nhead=nhead))
    out = fwd(src, params)
    jax.block_until_ready(out)

    assert out.shape == (S, B, d_model)
    assert bool(jnp.all(jnp.isfinite(out)))
    print("KERNEL_OK")
</pallas_src>

<mosaic_0001>
module attributes {stable_mosaic.version = 11 : i64} {
  func.func @_encoder_layer_kernel(%arg0: i32, %arg1: memref<1x8x32xf32, #tpu.memory_space<vmem>>, %arg2: memref<32x96xf32, #tpu.memory_space<vmem>>, %arg3: memref<1x96xf32, #tpu.memory_space<vmem>>, %arg4: memref<32x32xf32, #tpu.memory_space<vmem>>, %arg5: memref<1x32xf32, #tpu.memory_space<vmem>>, %arg6: memref<32x32xf32, #tpu.memory_space<vmem>>, %arg7: memref<32x32xf32, #tpu.memory_space<vmem>>, %arg8: memref<1x32xf32, #tpu.memory_space<vmem>>, %arg9: memref<1x32xf32, #tpu.memory_space<vmem>>, %arg10: memref<1x32xf32, #tpu.memory_space<vmem>>, %arg11: memref<32x64xf32, #tpu.memory_space<vmem>>, %arg12: memref<1x64xf32, #tpu.memory_space<vmem>>, %arg13: memref<64x32xf32, #tpu.memory_space<vmem>>, %arg14: memref<1x32xf32, #tpu.memory_space<vmem>>, %arg15: memref<1x32xf32, #tpu.memory_space<vmem>>, %arg16: memref<1x32xf32, #tpu.memory_space<vmem>>, %arg17: memref<1x8x32xf32, #tpu.memory_space<vmem>>) attributes {dimension_semantics = [#tpu.dimension_semantics<parallel>], iteration_bounds = array<i64: 2>, scalar_prefetch = 0 : i64, scratch_operands = 0 : i64, tpu.core_type = #tpu.core_type<tc>, window_params = [{transform_indices = @transform_0, window_bounds = array<i64: 1, 8, 32>}, {pipeline_mode = #tpu.pipeline_mode<synchronous>, transform_indices = @transform_1, window_bounds = array<i64: 32, 96>}, {pipeline_mode = #tpu.pipeline_mode<synchronous>, transform_indices = @transform_2, window_bounds = array<i64: 1, 96>}, {pipeline_mode = #tpu.pipeline_mode<synchronous>, transform_indices = @transform_3, window_bounds = array<i64: 32, 32>}, {pipeline_mode = #tpu.pipeline_mode<synchronous>, transform_indices = @transform_4, window_bounds = array<i64: 1, 32>}, {pipeline_mode = #tpu.pipeline_mode<synchronous>, transform_indices = @transform_5, window_bounds = array<i64: 32, 32>}, {pipeline_mode = #tpu.pipeline_mode<synchronous>, transform_indices = @transform_6, window_bounds = array<i64: 32, 32>}, {pipeline_mode = #tpu.pipeline_mode<synchronous>, transform_indices = @transform_7, window_bounds = array<i64: 1, 32>}, {pipeline_mode = #tpu.pipeline_mode<synchronous>, transform_indices = @transform_8, window_bounds = array<i64: 1, 32>}, {pipeline_mode = #tpu.pipeline_mode<synchronous>, transform_indices = @transform_9, window_bounds = array<i64: 1, 32>}, {pipeline_mode = #tpu.pipeline_mode<synchronous>, transform_indices = @transform_10, window_bounds = array<i64: 32, 64>}, {pipeline_mode = #tpu.pipeline_mode<synchronous>, transform_indices = @transform_11, window_bounds = array<i64: 1, 64>}, {pipeline_mode = #tpu.pipeline_mode<synchronous>, transform_indices = @transform_12, window_bounds = array<i64: 64, 32>}, {pipeline_mode = #tpu.pipeline_mode<synchronous>, transform_indices = @transform_13, window_bounds = array<i64: 1, 32>}, {pipeline_mode = #tpu.pipeline_mode<synchronous>, transform_indices = @transform_14, window_bounds = array<i64: 1, 32>}, {pipeline_mode = #tpu.pipeline_mode<synchronous>, transform_indices = @transform_15, window_bounds = array<i64: 1, 32>}, {transform_indices = @transform_16, window_bounds = array<i64: 1, 8, 32>}]} {
    %c0 = arith.constant 0 : index
    %c0_0 = arith.constant 0 : index
    %c0_1 = arith.constant 0 : index
    %0 = vector.load %arg1[%c0, %c0_0, %c0_1] : memref<1x8x32xf32, #tpu.memory_space<vmem>>, vector<1x8x32xf32>
    %1 = vector.shape_cast %0 : vector<1x8x32xf32> to vector<8x32xf32>
    %c0_2 = arith.constant 0 : index
    %c0_3 = arith.constant 0 : index
    %2 = vector.load %arg2[%c0_2, %c0_3] : memref<32x96xf32, #tpu.memory_space<vmem>>, vector<32x96xf32>
    %cst = arith.constant dense<0.000000e+00> : vector<8x96xf32>
    %3 = tpu.matmul %1, %2, %cst {dimension_numbers = #tpu.dot_dimension_numbers<[1], [0], [0], [1], [0, 0, 1, 1], [], []>} : vector<8x32xf32>, vector<32x96xf32>, vector<8x96xf32> -> vector<8x96xf32>
    %c0_4 = arith.constant 0 : index
    %c0_5 = arith.constant 0 : index
    %4 = vector.load %arg3[%c0_4, %c0_5] : memref<1x96xf32, #tpu.memory_space<vmem>>, vector<1x96xf32>
    %5 = vector.broadcast %4 : vector<1x96xf32> to vector<8x96xf32>
    %6 = arith.addf %3, %5 : vector<8x96xf32>
    %7 = vector.extract_strided_slice %6 {offsets = [0, 0], sizes = [8, 32], strides = [1, 1]} : vector<8x96xf32> to vector<8x32xf32>
    %cst_6 = arith.constant 0.353553385 : f32
    %8 = vector.broadcast %cst_6 : f32 to vector<8x32xf32>
    %9 = arith.mulf %7, %8 : vector<8x32xf32>
    %10 = vector.extract_strided_slice %6 {offsets = [0, 32], sizes = [8, 32], strides = [1, 1]} : vector<8x96xf32> to vector<8x32xf32>
    %11 = vector.extract_strided_slice %6 {offsets = [0, 64], sizes = [8, 32], strides = [1, 1]} : vector<8x96xf32> to vector<8x32xf32>
    %12 = vector.extract_strided_slice %9 {offsets = [0, 0], sizes = [8, 8], strides = [1, 1]} : vector<8x32xf32> to vector<8x8xf32>
    %13 = vector.extract_strided_slice %10 {offsets = [0, 0], sizes = [8, 8], strides = [1, 1]} : vector<8x32xf32> to vector<8x8xf32>
    %14 = vector.extract_strided_slice %11 {offsets = [0, 0], sizes = [8, 8], strides = [1, 1]} : vector<8x32xf32> to vector<8x8xf32>
    %cst_7 = arith.constant dense<0.000000e+00> : vector<8x8xf32>
    %15 = tpu.matmul %12, %13, %cst_7 {dimension_numbers = #tpu.dot_dimension_numbers<[1], [1], [0], [0], [0, 0, 1, 0], [], []>} : vector<8x8xf32>, vector<8x8xf32>, vector<8x8xf32> -> vector<8x8xf32>
    %cst_8 = arith.constant dense<0xFF800000> : vector<8xf32>
    %16 = vector.multi_reduction <maximumf>, %15, %cst_8 [1] : vector<8x8xf32> to vector<8xf32>
    %17 = vector.shape_cast %16 : vector<8xf32> to vector<8x1xf32>
    %18 = vector.broadcast %17 : vector<8x1xf32> to vector<8x8xf32>
    %19 = arith.subf %15, %18 : vector<8x8xf32>
    %20 = math.exp %19 : vector<8x8xf32>
    %cst_9 = arith.constant dense<0.000000e+00> : vector<8xf32>
    %21 = vector.multi_reduction <add>, %20, %cst_9 [1] : vector<8x8xf32> to vector<8xf32>
    %22 = vector.shape_cast %21 : vector<8xf32> to vector<8x1xf32>
    %23 = tpu.reciprocal %22 {approx = true} : vector<8x1xf32> -> vector<8x1xf32>
    %24 = vector.broadcast %23 : vector<8x1xf32> to vector<8x8xf32>
    %25 = arith.mulf %20, %24 : vector<8x8xf32>
    %cst_10 = arith.constant dense<0.000000e+00> : vector<8x8xf32>
    %26 = tpu.matmul %25, %14, %cst_10 {dimension_numbers = #tpu.dot_dimension_numbers<[1], [0], [0], [1], [0, 0, 1, 1], [], []>} : vector<8x8xf32>, vector<8x8xf32>, vector<8x8xf32> -> vector<8x8xf32>
    %27 = vector.extract_strided_slice %9 {offsets = [0, 8], sizes = [8, 8], strides = [1, 1]} : vector<8x32xf32> to vector<8x8xf32>
    %28 = vector.extract_strided_slice %10 {offsets = [0, 8], sizes = [8, 8], strides = [1, 1]} : vector<8x32xf32> to vector<8x8xf32>
    %29 = vector.extract_strided_slice %11 {offsets = [0, 8], sizes = [8, 8], strides = [1, 1]} : vector<8x32xf32> to vector<8x8xf32>
    %cst_11 = arith.constant dense<0.000000e+00> : vector<8x8xf32>
    %30 = tpu.matmul %27, %28, %cst_11 {dimension_numbers = #tpu.dot_dimension_numbers<[1], [1], [0], [0], [0, 0, 1, 0], [], []>} : vector<8x8xf32>, vector<8x8xf32>, vector<8x8xf32> -> vector<8x8xf32>
    %cst_12 = arith.constant dense<0xFF800000> : vector<8xf32>
    %31 = vector.multi_reduction <maximumf>, %30, %cst_12 [1] : vector<8x8xf32> to vector<8xf32>
    %32 = vector.shape_cast %31 : vector<8xf32> to vector<8x1xf32>
    %33 = vector.broadcast %32 : vector<8x1xf32> to vector<8x8xf32>
    %34 = arith.subf %30, %33 : vector<8x8xf32>
    %35 = math.exp %34 : vector<8x8xf32>
    %cst_13 = arith.constant dense<0.000000e+00> : vector<8xf32>
    %36 = vector.multi_reduction <add>, %35, %cst_13 [1] : vector<8x8xf32> to vector<8xf32>
    %37 = vector.shape_cast %36 : vector<8xf32> to vector<8x1xf32>
    %38 = tpu.reciprocal %37 {approx = true} : vector<8x1xf32> -> vector<8x1xf32>
    %39 = vector.broadcast %38 : vector<8x1xf32> to vector<8x8xf32>
    %40 = arith.mulf %35, %39 : vector<8x8xf32>
    %cst_14 = arith.constant dense<0.000000e+00> : vector<8x8xf32>
    %41 = tpu.matmul %40, %29, %cst_14 {dimension_numbers = #tpu.dot_dimension_numbers<[1], [0], [0], [1], [0, 0, 1, 1], [], []>} : vector<8x8xf32>, vector<8x8xf32>, vector<8x8xf32> -> vector<8x8xf32>
    %42 = vector.extract_strided_slice %9 {offsets = [0, 16], sizes = [8, 8], strides = [1, 1]} : vector<8x32xf32> to vector<8x8xf32>
    %43 = vector.extract_strided_slice %10 {offsets = [0, 16], sizes = [8, 8], strides = [1, 1]} : vector<8x32xf32> to vector<8x8xf32>
    %44 = vector.extract_strided_slice %11 {offsets = [0, 16], sizes = [8, 8], strides = [1, 1]} : vector<8x32xf32> to vector<8x8xf32>
    %cst_15 = arith.constant dense<0.000000e+00> : vector<8x8xf32>
    %45 = tpu.matmul %42, %43, %cst_15 {dimension_numbers = #tpu.dot_dimension_numbers<[1], [1], [0], [0], [0, 0, 1, 0], [], []>} : vector<8x8xf32>, vector<8x8xf32>, vector<8x8xf32> -> vector<8x8xf32>
    %cst_16 = arith.constant dense<0xFF800000> : vector<8xf32>
    %46 = vector.multi_reduction <maximumf>, %45, %cst_16 [1] : vector<8x8xf32> to vector<8xf32>
    %47 = vector.shape_cast %46 : vector<8xf32> to vector<8x1xf32>
    %48 = vector.broadcast %47 : vector<8x1xf32> to vector<8x8xf32>
    %49 = arith.subf %45, %48 : vector<8x8xf32>
    %50 = math.exp %49 : vector<8x8xf32>
    %cst_17 = arith.constant dense<0.000000e+00> : vector<8xf32>
    %51 = vector.multi_reduction <add>, %50, %cst_17 [1] : vector<8x8xf32> to vector<8xf32>
    %52 = vector.shape_cast %51 : vector<8xf32> to vector<8x1xf32>
    %53 = tpu.reciprocal %52 {approx = true} : vector<8x1xf32> -> vector<8x1xf32>
    %54 = vector.broadcast %53 : vector<8x1xf32> to vector<8x8xf32>
    %55 = arith.mulf %50, %54 : vector<8x8xf32>
    %cst_18 = arith.constant dense<0.000000e+00> : vector<8x8xf32>
    %56 = tpu.matmul %55, %44, %cst_18 {dimension_numbers = #tpu.dot_dimension_numbers<[1], [0], [0], [1], [0, 0, 1, 1], [], []>} : vector<8x8xf32>, vector<8x8xf32>, vector<8x8xf32> -> vector<8x8xf32>
    %57 = vector.extract_strided_slice %9 {offsets = [0, 24], sizes = [8, 8], strides = [1, 1]} : vector<8x32xf32> to vector<8x8xf32>
    %58 = vector.extract_strided_slice %10 {offsets = [0, 24], sizes = [8, 8], strides = [1, 1]} : vector<8x32xf32> to vector<8x8xf32>
    %59 = vector.extract_strided_slice %11 {offsets = [0, 24], sizes = [8, 8], strides = [1, 1]} : vector<8x32xf32> to vector<8x8xf32>
    %cst_19 = arith.constant dense<0.000000e+00> : vector<8x8xf32>
    %60 = tpu.matmul %57, %58, %cst_19 {dimension_numbers = #tpu.dot_dimension_numbers<[1], [1], [0], [0], [0, 0, 1, 0], [], []>} : vector<8x8xf32>, vector<8x8xf32>, vector<8x8xf32> -> vector<8x8xf32>
    %cst_20 = arith.constant dense<0xFF800000> : vector<8xf32>
    %61 = vector.multi_reduction <maximumf>, %60, %cst_20 [1] : vector<8x8xf32> to vector<8xf32>
    %62 = vector.shape_cast %61 : vector<8xf32> to vector<8x1xf32>
    %63 = vector.broadcast %62 : vector<8x1xf32> to vector<8x8xf32>
    %64 = arith.subf %60, %63 : vector<8x8xf32>
    %65 = math.exp %64 : vector<8x8xf32>
    %cst_21 = arith.constant dense<0.000000e+00> : vector<8xf32>
    %66 = vector.multi_reduction <add>, %65, %cst_21 [1] : vector<8x8xf32> to vector<8xf32>
    %67 = vector.shape_cast %66 : vector<8xf32> to vector<8x1xf32>
    %68 = tpu.reciprocal %67 {approx = true} : vector<8x1xf32> -> vector<8x1xf32>
    %69 = vector.broadcast %68 : vector<8x1xf32> to vector<8x8xf32>
    %70 = arith.mulf %65, %69 : vector<8x8xf32>
    %cst_22 = arith.constant dense<0.000000e+00> : vector<8x8xf32>
    %71 = tpu.matmul %70, %59, %cst_22 {dimension_numbers = #tpu.dot_dimension_numbers<[1], [0], [0], [1], [0, 0, 1, 1], [], []>} : vector<8x8xf32>, vector<8x8xf32>, vector<8x8xf32> -> vector<8x8xf32>
    %72 = tpu.concatenate %26, %41, %56, %71 in 1 : vector<8x8xf32>, vector<8x8xf32>, vector<8x8xf32>, vector<8x8xf32> -> vector<8x32xf32>
    %c0_23 = arith.constant 0 : index
    %c0_24 = arith.constant 0 : index
    %73 = vector.load %arg4[%c0_23, %c0_24] : memref<32x32xf32, #tpu.memory_space<vmem>>, vector<32x32xf32>
    %cst_25 = arith.constant dense<0.000000e+00> : vector<8x32xf32>
    %74 = tpu.matmul %72, %73, %cst_25 {dimension_numbers = #tpu.dot_dimension_numbers<[1], [0], [0], [1], [0, 0, 1, 1], [], []>} : vector<8x32xf32>, vector<32x32xf32>, vector<8x32xf32> -> vector<8x32xf32>
    %c0_26 = arith.constant 0 : index
    %c0_27 = arith.constant 0 : index
    %75 = vector.load %arg5[%c0_26, %c0_27] : memref<1x32xf32, #tpu.memory_space<vmem>>, vector<1x32xf32>
    %76 = vector.broadcast %75 : vector<1x32xf32> to vector<8x32xf32>
    %77 = arith.addf %74, %76 : vector<8x32xf32>
    %c0_28 = arith.constant 0 : index
    %c0_29 = arith.constant 0 : index
    %78 = vector.load %arg6[%c0_28, %c0_29] : memref<32x32xf32, #tpu.memory_space<vmem>>, vector<32x32xf32>
    %cst_30 = arith.constant dense<0.000000e+00> : vector<8x32xf32>
    %79 = tpu.matmul %77, %78, %cst_30 {dimension_numbers = #tpu.dot_dimension_numbers<[1], [0], [0], [1], [0, 0, 1, 1], [], []>} : vector<8x32xf32>, vector<32x32xf32>, vector<8x32xf32> -> vector<8x32xf32>
    %c0_31 = arith.constant 0 : index
    %c0_32 = arith.constant 0 : index
    %80 = vector.load %arg7[%c0_31, %c0_32] : memref<32x32xf32, #tpu.memory_space<vmem>>, vector<32x32xf32>
    %cst_33 = arith.constant dense<0.000000e+00> : vector<8x32xf32>
    %81 = tpu.matmul %1, %80, %cst_33 {dimension_numbers = #tpu.dot_dimension_numbers<[1], [0], [0], [1], [0, 0, 1, 1], [], []>} : vector<8x32xf32>, vector<32x32xf32>, vector<8x32xf32> -> vector<8x32xf32>
    %82 = arith.addf %79, %81 : vector<8x32xf32>
    %c0_34 = arith.constant 0 : index
    %c0_35 = arith.constant 0 : index
    %83 = vector.load %arg8[%c0_34, %c0_35] : memref<1x32xf32, #tpu.memory_space<vmem>>, vector<1x32xf32>
    %84 = vector.broadcast %83 : vector<1x32xf32> to vector<8x32xf32>
    %85 = arith.addf %82, %84 : vector<8x32xf32>
    %86 = arith.addf %1, %85 : vector<8x32xf32>
    %cst_36 = arith.constant dense<0.000000e+00> : vector<8xf32>
    %87 = vector.multi_reduction <add>, %86, %cst_36 [1] : vector<8x32xf32> to vector<8xf32>
    %88 = vector.shape_cast %87 : vector<8xf32> to vector<8x1xf32>
    %cst_37 = arith.constant 3.200000e+01 : f32
    %89 = vector.broadcast %cst_37 : f32 to vector<8x1xf32>
    %90 = arith.divf %88, %89 : vector<8x1xf32>
    %91 = vector.broadcast %90 : vector<8x1xf32> to vector<8x32xf32>
    %92 = arith.subf %86, %91 : vector<8x32xf32>
    %93 = arith.mulf %92, %92 : vector<8x32xf32>
    %cst_38 = arith.constant dense<0.000000e+00> : vector<8xf32>
    %94 = vector.multi_reduction <add>, %93, %cst_38 [1] : vector<8x32xf32> to vector<8xf32>
    %95 = vector.shape_cast %94 : vector<8xf32> to vector<8x1xf32>
    %cst_39 = arith.constant 3.200000e+01 : f32
    %96 = vector.broadcast %cst_39 : f32 to vector<8x1xf32>
    %97 = arith.divf %95, %96 : vector<8x1xf32>
    %98 = vector.broadcast %90 : vector<8x1xf32> to vector<8x32xf32>
    %99 = arith.subf %86, %98 : vector<8x32xf32>
    %cst_40 = arith.constant 9.99999974E-6 : f32
    %100 = vector.broadcast %cst_40 : f32 to vector<8x1xf32>
    %101 = arith.addf %97, %100 : vector<8x1xf32>
    %102 = math.rsqrt %101 : vector<8x1xf32>
    %103 = vector.broadcast %102 : vector<8x1xf32> to vector<8x32xf32>
    %104 = arith.mulf %99, %103 : vector<8x32xf32>
    %c0_41 = arith.constant 0 : index
    %c0_42 = arith.constant 0 : index
    %105 = vector.load %arg9[%c0_41, %c0_42] : memref<1x32xf32, #tpu.memory_space<vmem>>, vector<1x32xf32>
    %106 = vector.broadcast %105 : vector<1x32xf32> to vector<8x32xf32>
    %107 = arith.mulf %104, %106 : vector<8x32xf32>
    %c0_43 = arith.constant 0 : index
    %c0_44 = arith.constant 0 : index
    %108 = vector.load %arg10[%c0_43, %c0_44] : memref<1x32xf32, #tpu.memory_space<vmem>>, vector<1x32xf32>
    %109 = vector.broadcast %108 : vector<1x32xf32> to vector<8x32xf32>
    %110 = arith.addf %107, %109 : vector<8x32xf32>
    %c0_45 = arith.constant 0 : index
    %c0_46 = arith.constant 0 : index
    %111 = vector.load %arg11[%c0_45, %c0_46] : memref<32x64xf32, #tpu.memory_space<vmem>>, vector<32x64xf32>
    %cst_47 = arith.constant dense<0.000000e+00> : vector<8x64xf32>
    %112 = tpu.matmul %110, %111, %cst_47 {dimension_numbers = #tpu.dot_dimension_numbers<[1], [0], [0], [1], [0, 0, 1, 1], [], []>} : vector<8x32xf32>, vector<32x64xf32>, vector<8x64xf32> -> vector<8x64xf32>
    %c0_48 = arith.constant 0 : index
    %c0_49 = arith.constant 0 : index
    %113 = vector.load %arg12[%c0_48, %c0_49] : memref<1x64xf32, #tpu.memory_space<vmem>>, vector<1x64xf32>
    %114 = vector.broadcast %113 : vector<1x64xf32> to vector<8x64xf32>
    %115 = arith.addf %112, %114 : vector<8x64xf32>
    %cst_50 = arith.constant 0.000000e+00 : f32
    %116 = vector.broadcast %cst_50 : f32 to vector<8x64xf32>
    %117 = arith.maximumf %115, %116 : vector<8x64xf32>
    %c0_51 = arith.constant 0 : index
    %c0_52 = arith.constant 0 : index
    %118 = vector.load %arg13[%c0_51, %c0_52] : memref<64x32xf32, #tpu.memory_space<vmem>>, vector<64x32xf32>
    %cst_53 = arith.constant dense<0.000000e+00> : vector<8x32xf32>
    %119 = tpu.matmul %117, %118, %cst_53 {dimension_numbers = #tpu.dot_dimension_numbers<[1], [0], [0], [1], [0, 0, 1, 1], [], []>} : vector<8x64xf32>, vector<64x32xf32>, vector<8x32xf32> -> vector<8x32xf32>
    %c0_54 = arith.constant 0 : index
    %c0_55 = arith.constant 0 : index
    %120 = vector.load %arg14[%c0_54, %c0_55] : memref<1x32xf32, #tpu.memory_space<vmem>>, vector<1x32xf32>
    %121 = vector.broadcast %120 : vector<1x32xf32> to vector<8x32xf32>
    %122 = arith.addf %119, %121 : vector<8x32xf32>
    %123 = arith.addf %110, %122 : vector<8x32xf32>
    %cst_56 = arith.constant dense<0.000000e+00> : vector<8xf32>
    %124 = vector.multi_reduction <add>, %123, %cst_56 [1] : vector<8x32xf32> to vector<8xf32>
    %125 = vector.shape_cast %124 : vector<8xf32> to vector<8x1xf32>
    %cst_57 = arith.constant 3.200000e+01 : f32
    %126 = vector.broadcast %cst_57 : f32 to vector<8x1xf32>
    %127 = arith.divf %125, %126 : vector<8x1xf32>
    %128 = vector.broadcast %127 : vector<8x1xf32> to vector<8x32xf32>
    %129 = arith.subf %123, %128 : vector<8x32xf32>
    %130 = arith.mulf %129, %129 : vector<8x32xf32>
    %cst_58 = arith.constant dense<0.000000e+00> : vector<8xf32>
    %131 = vector.multi_reduction <add>, %130, %cst_58 [1] : vector<8x32xf32> to vector<8xf32>
    %132 = vector.shape_cast %131 : vector<8xf32> to vector<8x1xf32>
    %cst_59 = arith.constant 3.200000e+01 : f32
    %133 = vector.broadcast %cst_59 : f32 to vector<8x1xf32>
    %134 = arith.divf %132, %133 : vector<8x1xf32>
    %135 = vector.broadcast %127 : vector<8x1xf32> to vector<8x32xf32>
    %136 = arith.subf %123, %135 : vector<8x32xf32>
    %cst_60 = arith.constant 9.99999974E-6 : f32
    %137 = vector.broadcast %cst_60 : f32 to vector<8x1xf32>
    %138 = arith.addf %134, %137 : vector<8x1xf32>
    %139 = math.rsqrt %138 : vector<8x1xf32>
    %140 = vector.broadcast %139 : vector<8x1xf32> to vector<8x32xf32>
    %141 = arith.mulf %136, %140 : vector<8x32xf32>
    %c0_61 = arith.constant 0 : index
    %c0_62 = arith.constant 0 : index
    %142 = vector.load %arg15[%c0_61, %c0_62] : memref<1x32xf32, #tpu.memory_space<vmem>>, vector<1x32xf32>
    %143 = vector.broadcast %142 : vector<1x32xf32> to vector<8x32xf32>
    %144 = arith.mulf %141, %143 : vector<8x32xf32>
    %c0_63 = arith.constant 0 : index
    %c0_64 = arith.constant 0 : index
    %145 = vector.load %arg16[%c0_63, %c0_64] : memref<1x32xf32, #tpu.memory_space<vmem>>, vector<1x32xf32>
    %146 = vector.broadcast %145 : vector<1x32xf32> to vector<8x32xf32>
    %147 = arith.addf %144, %146 : vector<8x32xf32>
    %c0_65 = arith.constant 0 : index
    %c0_66 = arith.constant 0 : index
    %c0_67 = arith.constant 0 : index
    %148 = vector.load %arg17[%c0_65, %c0_66, %c0_67] : memref<1x8x32xf32, #tpu.memory_space<vmem>>, vector<1x8x32xf32>
    %149 = vector.shape_cast %148 : vector<1x8x32xf32> to vector<8x32xf32>
    %150 = vector.shape_cast %147 : vector<8x32xf32> to vector<1x8x32xf32>
    tpu.vector_store %arg17[%c0_65, %c0_66, %c0_67], %150 {strides = array<i32>} : memref<1x8x32xf32, #tpu.memory_space<vmem>>, vector<1x8x32xf32>,
    return
  }
  func.func @transform_0(%arg0: i32) -> (i32, i32, i32) {
    %c0_i32 = arith.constant 0 : i32
    %c0_i32_0 = arith.constant 0 : i32
    %c0_i32_1 = arith.constant 0 : i32
    return %arg0, %c0_i32, %c0_i32_0 : i32, i32, i32
  }
  func.func @transform_1(%arg0: i32) -> (i32, i32) {
    %c0_i32 = arith.constant 0 : i32
    %c0_i32_0 = arith.constant 0 : i32
    %c0_i32_1 = arith.constant 0 : i32
    return %c0_i32, %c0_i32_0 : i32, i32
  }
  func.func @transform_2(%arg0: i32) -> (i32, i32) {
    %c0_i32 = arith.constant 0 : i32
    %c0_i32_0 = arith.constant 0 : i32
    %c0_i32_1 = arith.constant 0 : i32
    return %c0_i32, %c0_i32_0 : i32, i32
  }
  func.func @transform_3(%arg0: i32) -> (i32, i32) {
    %c0_i32 = arith.constant 0 : i32
    %c0_i32_0 = arith.constant 0 : i32
    %c0_i32_1 = arith.constant 0 : i32
    return %c0_i32, %c0_i32_0 : i32, i32
  }
  func.func @transform_4(%arg0: i32) -> (i32, i32) {
    %c0_i32 = arith.constant 0 : i32
    %c0_i32_0 = arith.constant 0 : i32
    %c0_i32_1 = arith.constant 0 : i32
    return %c0_i32, %c0_i32_0 : i32, i32
  }
  func.func @transform_5(%arg0: i32) -> (i32, i32) {
    %c0_i32 = arith.constant 0 : i32
    %c0_i32_0 = arith.constant 0 : i32
    %c0_i32_1 = arith.constant 0 : i32
    return %c0_i32, %c0_i32_0 : i32, i32
  }
  func.func @transform_6(%arg0: i32) -> (i32, i32) {
    %c0_i32 = arith.constant 0 : i32
    %c0_i32_0 = arith.constant 0 : i32
    %c0_i32_1 = arith.constant 0 : i32
    return %c0_i32, %c0_i32_0 : i32, i32
  }
  func.func @transform_7(%arg0: i32) -> (i32, i32) {
    %c0_i32 = arith.constant 0 : i32
    %c0_i32_0 = arith.constant 0 : i32
    %c0_i32_1 = arith.constant 0 : i32
    return %c0_i32, %c0_i32_0 : i32, i32
  }
  func.func @transform_8(%arg0: i32) -> (i32, i32) {
    %c0_i32 = arith.constant 0 : i32
    %c0_i32_0 = arith.constant 0 : i32
    %c0_i32_1 = arith.constant 0 : i32
    return %c0_i32, %c0_i32_0 : i32, i32
  }
  func.func @transform_9(%arg0: i32) -> (i32, i32) {
    %c0_i32 = arith.constant 0 : i32
    %c0_i32_0 = arith.constant 0 : i32
    %c0_i32_1 = arith.constant 0 : i32
    return %c0_i32, %c0_i32_0 : i32, i32
  }
  func.func @transform_10(%arg0: i32) -> (i32, i32) {
    %c0_i32 = arith.constant 0 : i32
    %c0_i32_0 = arith.constant 0 : i32
    %c0_i32_1 = arith.constant 0 : i32
    return %c0_i32, %c0_i32_0 : i32, i32
  }
  func.func @transform_11(%arg0: i32) -> (i32, i32) {
    %c0_i32 = arith.constant 0 : i32
    %c0_i32_0 = arith.constant 0 : i32
    %c0_i32_1 = arith.constant 0 : i32
    return %c0_i32, %c0_i32_0 : i32, i32
  }
  func.func @transform_12(%arg0: i32) -> (i32, i32) {
    %c0_i32 = arith.constant 0 : i32
    %c0_i32_0 = arith.constant 0 : i32
    %c0_i32_1 = arith.constant 0 : i32
    return %c0_i32, %c0_i32_0 : i32, i32
  }
  func.func @transform_13(%arg0: i32) -> (i32, i32) {
    %c0_i32 = arith.constant 0 : i32
    %c0_i32_0 = arith.constant 0 : i32
    %c0_i32_1 = arith.constant 0 : i32
    return %c0_i32, %c0_i32_0 : i32, i32
  }
  func.func @transform_14(%arg0: i32) -> (i32, i32) {
    %c0_i32 = arith.constant 0 : i32
    %c0_i32_0 = arith.constant 0 : i32
    %c0_i32_1 = arith.constant 0 : i32
    return %c0_i32, %c0_i32_0 : i32, i32
  }
  func.func @transform_15(%arg0: i32) -> (i32, i32) {
    %c0_i32 = arith.constant 0 : i32
    %c0_i32_0 = arith.constant 0 : i32
    %c0_i32_1 = arith.constant 0 : i32
    return %c0_i32, %c0_i32_0 : i32, i32
  }
  func.func @transform_16(%arg0: i32) -> (i32, i32, i32) {
    %c0_i32 = arith.constant 0 : i32
    %c0_i32_0 = arith.constant 0 : i32
    %c0_i32_1 = arith.constant 0 : i32
    return %arg0, %c0_i32, %c0_i32_0 : i32, i32, i32
  }
}

</mosaic_0001>

<bundles_post_ra>
// kernel: transformer_encoder_layer.1
= control target key start
LH: loop header
LB: loop body
LE: loop exit
PB: predicated region body
PF: predicated region fallthrough
CT: control target
= control target key end

     0   :  { %s2577_s0 = inlined_call_operand.vmem [shape: f32[2,8,32], index: 0, kind: input, shape index: {}]   ;;  %s2578_s1 = inlined_call_operand.vmem [shape: f32[32,96], index: 1, kind: input, shape index: {}]   ;;  %s2579_s2 = inlined_call_operand.vmem [shape: f32[1,96], index: 2, kind: input, shape index: {}]   ;;  %s2580_s3 = inlined_call_operand.vmem [shape: f32[32,32], index: 3, kind: input, shape index: {}]   ;;  %s2581_s4 = inlined_call_operand.vmem [shape: f32[1,32], index: 4, kind: input, shape index: {}]   ;;  %s2582_s5 = inlined_call_operand.vmem [shape: f32[32,32], index: 5, kind: input, shape index: {}]   ;;  %s2583_s6 = inlined_call_operand.hbm [shape: f32[32,32], index: 6, kind: input, shape index: {}]   ;;  %s2584_s7 = inlined_call_operand.vmem [shape: f32[1,32], index: 7, kind: input, shape index: {}]   ;;  %s2585_s8 = inlined_call_operand.vmem [shape: f32[1,32], index: 8, kind: input, shape index: {}]   ;;  %s2586_s9 = inlined_call_operand.vmem [shape: f32[1,32], index: 9, kind: input, shape index: {}]   ;;  %s2587_s10 = inlined_call_operand.hbm [shape: f32[32,64], index: 10, kind: input, shape index: {}]   ;;  %s2588_s11 = inlined_call_operand.vmem [shape: f32[1,64], index: 11, kind: input, shape index: {}]   ;;  %s2589_s12 = inlined_call_operand.vmem [shape: f32[64,32], index: 12, kind: input, shape index: {}]   ;;  %s2590_s13 = inlined_call_operand.vmem [shape: f32[1,32], index: 13, kind: input, shape index: {}]   ;;  %s2591_s14 = inlined_call_operand.vmem [shape: f32[1,32], index: 14, kind: input, shape index: {}]   ;;  %s2592_s15 = inlined_call_operand.vmem [shape: f32[1,32], index: 15, kind: input, shape index: {}]   ;;  %s2593_s16 = inlined_call_operand.vmem [shape: f32[2,8,32], index: 16, kind: output, shape index: {}]  }
   0x1   :  { %2594 = sst [smem:[#allocation8_spill]] %s2577_s0 }
   0x2   :  { %21 = vsyncpa [#allocation3], 0 }
   0x3   :  { %22 = vsyncpa [#allocation5], 0  ;;  %s2310_s21 = smov 0  }
   0x4 LB: > { %s2316_s22 = sadd.s32 4294967295, %s2203_s21   ;;  %p1868_p0 = scmp.ge.s32.totalorder %s2203_s21, 1  ;;  %s2203_s21 = sphi %s2310_s21, %s28_s21  }
   0x5   : > { %p400_p1 = scmp.lt.s32.totalorder %s2203_s21, 3  ;;  %s2205_s23 = smov [#allocation2]  }
   0x6   : > { %s427_s24 = sshll.u32 %s2205_s23, 4  ;;  %p2085_p3 = scmp.eq.s32.totalorder %s2316_s22, 0  ;;  %s428_s24 = int_to_ptr.vmem [resolvable:$true] %s427_s24 }
   0x7   : > { %p2320_p2 = pnand %p1868_p0, %p400_p1  ;;  %s2206_s26 = smov [#allocation4]  }
   0x8   : > { %s449_s27 = sshll.u32 %s2206_s26, 4  ;;  %s2148_s29 = scalar_lea.vmem %s428_s24, 512  ;;  %s450_s27 = int_to_ptr.vmem [resolvable:$true] %s449_s27 }
   0x9   : > { %p2078_p4 = pneg %p2320_p2  ;;  %p2149_p7 = scmp.ne.s32.totalorder %s428_s24, %s2148_s29 }
   0xa   : > { %p2156_p10 = scmp.lt.s32.totalorder %s428_s24, %s428_s24  ;;  %p2157_p11 = scmp.lt.s32.totalorder %s2148_s29, %s2148_s29 }
   0xb   : > { %p2329_p5 = pnand %p2085_p3, %p2078_p4 }
   0xc   : > { %p2158_p12 = por %p2157_p11, %p2156_p10 }
   0xd   : > { %p2139_p6 = pneg %p2329_p5 }
   0xf   : > { %p2151_p8 = pnand %p2149_p7, %p2139_p6 }
  0x11   : > { %p2152_p9 = pneg %p2151_p8 }
  0x13   : > { %p2159_p13 = pnand %p2158_p12, %p2152_p9 }
  0x15   : > { %2162 = shalt.err (!%p2159_p13)
}
  0x16   : > { %s2207_s30 = smov 128   ;;  %s2208_s0 = smov 8  }
  0x17   : > { %2081 = dma.hbm_to_vmem [thread:$0]  (!%p2329_p5), %s2583_s6, 512, %s428_s24, [#allocation3], %s2207_s30, %s2207_s30, %s2208_s0  }
  0x18   : > { %s2174_s19 = scalar_lea.vmem %s450_s27, 512  ;;  %p2182_p7 = scmp.lt.s32.totalorder %s450_s27, %s450_s27 }
  0x19   : > { %p2175_p0 = scmp.ne.s32.totalorder %s450_s27, %s2174_s19  ;;  %p2183_p8 = scmp.lt.s32.totalorder %s2174_s19, %s2174_s19 }
  0x1b   : > { %p2177_p1 = pnand %p2175_p0, %p2139_p6  ;;  %p2184_p10 = por %p2183_p8, %p2182_p7 }
  0x1d   : > { %p2178_p4 = pneg %p2177_p1 }
  0x1f   : > { %p2185_p9 = pnand %p2184_p10, %p2178_p4 }
  0x21   : > { %2188 = shalt.err (!%p2185_p9)
}
  0x22   : > { %2084 = dma.hbm_to_vmem [thread:$0]  (!%p2329_p5), %s2587_s10, 512, %s450_s27, [#allocation5], %s2207_s30, %s2207_s30, %s2208_s0  }
  0x23   : > { %487 = sbr.rel (%p2320_p2) target bundleno = 2642 (0xa52), region = 84 }
  0x28   : > { %2194 = dma.done.wait (%p2085_p3), [#allocation3], 512  }
  0x29   : > { %2196 = vsyncadd (%p2085_p3), [#allocation3], 4294966784 }
  0x2a   : > { %2198 = dma.done.wait (%p2085_p3), [#allocation5], 512  }
  0x2b   : > { %2200 = vsyncadd (%p2085_p3), [#allocation5], 4294966784  ;;  %p539_p6 = scmp.lt.s32.totalorder %s2316_s22, 1  ;;  %v2209_v0 = vmov 0.0   ;;  %vm2210_vm0 = vmmov 0   ;;  %v551_v1 = vld [vmem:[%s2578_s1 + $0x18] sm:$0xff] }
  0x2c   : > { %1956 = vmatprep.subr.mxu1 %v2209_v0  ;;  %1964 = vmatprep.mubr.msk.f32.mxu1 %vm2210_vm0, %v2209_v0  ;;  %v550_v2 = vld [vmem:[%s2578_s1 + $0x10] sm:$0xff]  ;;  %v549_v3 = vld [vmem:[%s2578_s1 + $0x8] sm:$0xff]  ;;  %s2597_s18 = sld [smem:[#allocation8_spill]]  ;;  %v548_v4 = vld [vmem:[%s2578_s1] sm:$0xff]  ;;  %vm559_vm1 = vcmask 261120   ;;  %s2211_s27 = smov 96  }
  0x2d   : > { %s2599_s22 = smov (!%p539_p6, %s2316_s22), 1  ;;  %1977 = vmatprep.subr.mxu0 %v2209_v0  ;;  %1979 = vmatprep.mubr.msk.f32.mxu0 %vm2210_vm0, %v2209_v0  ;;  %v1877_v6 = vld [vmem:[%s2579_s2] ss:$0 sm:$0xff]  ;;  %s2212_s28 = smov 120   ;;  %vm637_vm2 = vcmask 64512   ;;  %vm1308_vm3 = vcmask 130048  }
  0x2e   : > { %s1875_s24 = sshll.u32 %s2599_s22, 3  ;;  %1957 = vmatpush3.msra.mxu1 %v551_v1  ;;  %s2213_s29 = smov 88   ;;  %vm1310_vm4 = vcmask 195584   ;;  %vm1686_vm5 = vcmask 523264  }
  0x2f   : > { %1958 = vmatprep.subr.mxu1 %v2209_v0  ;;  %s2214_s30 = smov 80   ;;  %s2215_s0 = smov 112  }
  0x30   : > { %1959 = vmatpush3.msra.mxu1 %v550_v2  ;;  %s2216_s17 = smov 72   ;;  %s2219_s20 = smov 64  }
  0x31   : > { %1960 = vmatprep.subr.mxu1 %v2209_v0  ;;  %s2220_s23 = smov 48   ;;  %s2221_s25 = smov 40  }
  0x32   : > { %s542_s19 = scalar_lea.vmem %s2597_s18, %s1875_s24  ;;  %1961 = vmatpush3.msra.mxu1 %v549_v3  ;;  %s2217_s18 = smov 104   ;;  %v1315_v3 = vld [vmem:[%s2580_s3 + $0x18] sm:$0xff] }
  0x33   : > { %v2391_v5 = vld [vmem:[%s542_s19] sm:$0xff]  ;;  %1962 = vmatprep.subr.mxu1 %v2209_v0  ;;  %s2218_s19 = smov 56  }
  0x34   : > { %1963 = vmatpush3.msra.mxu1 %v548_v4 }
  0x35   : > { %1965 = vmatmul.mubr.msk.f32.vlgmr.msra.gmra.mxu1 %vm559_vm1, %v2391_v5  ;;  %1967 = vmatprep.subr.mxu1 %v2209_v0 }
  0x36   : > { %1969 = vmatprep.mubr.msk.f32.mxu1 %vm2210_vm0, %v2209_v0 }
  0xf5   : > { %v629_v7 = vpop.f32.mrf.mxu1 }
  0xf6   : > { %v2402_v8 = vadd.f32 %v1877_v6, %v629_v7 }
  0xf7   : > { %v1966_v9 = vpop.f32.mrf.mxu1 }
  0xf8   : > { %635 = vrot.lane.b32.xlu0 %v2402_v8, %s2211_s27  ;;  %v633_v10 = vmul.f32 0.35355338, %v2402_v8  ;;  %v1314_v9 = vld [vmem:[%s2580_s3 + $0x10] sm:$0xff] }
  0xfa   : > { %800 = vrot.lane.b32.xlu1 %v633_v10, %s2212_s28  ;;  %s2222_s28 = smov 8  }
  0xfc   : > { %802 = vrot.lane.b32.xlu0 %v2402_v8, %s2213_s29 }
  0xfe   : > { %967 = vrot.lane.b32.xlu1 %v2402_v8, %s2214_s30 }
 0x100   : > { %965 = vrot.lane.b32.xlu0 %v633_v10, %s2215_s0  ;;  %s546_s0 = scalar_lea.vmem %s2593_s16, %s1875_s24 }
 0x102   : > { %1132 = vrot.lane.b32.xlu1 %v2402_v8, %s2216_s17 }
 0x104   : > { %1130 = vrot.lane.b32.xlu0 %v633_v10, %s2217_s18 }
 0x16a   : > { %v636_v11 = vpop.permute.xlu0 %635 }
 0x16b   : > { %1968 = vmatpush3.xpose.msk.msra.mxu1 %vm637_vm2, %v636_v11  ;;  %v1312_v11 = vld [vmem:[%s2580_s3] sm:$0xff] }
 0x16c   : > { %v801_v12 = vpop.permute.xlu1 %800  ;;  %1972 = vmatprep.subr.mxu1 %v2209_v0 }
 0x16e   : > { %v803_v13 = vpop.permute.xlu0 %802  ;;  %1970 = vmatmul.mubr.msk.f32.vlgmr.msra.gmra.mxu1 %vm637_vm2, %v633_v10  ;;  %v1313_v10 = vld [vmem:[%s2580_s3 + $0x8] sm:$0xff] }
 0x16f   : > { %1978 = vmatpush3.xpose.msk.msra.mxu0 %vm637_vm2, %v803_v13  ;;  %1974 = vmatprep.mubr.msk.f32.mxu1 %vm2210_vm0, %v2209_v0  ;;  %v1402_v13 = vld [vmem:[#allocation2 + $0x10] sm:$0xff] }
 0x170   : > { %v968_v14 = vpop.permute.xlu1 %967  ;;  %1987 = vmatprep.subr.mxu0 %v2209_v0 }
 0x172   : > { %1980 = vmatmul.mubr.msk.f32.vlgmr.msra.gmra.mxu0 %vm637_vm2, %v801_v12  ;;  %v966_v15 = vpop.permute.xlu0 %965  ;;  %v1403_v12 = vld [vmem:[#allocation2 + $0x18] sm:$0xff] }
 0x173   : > { %1988 = vmatpush3.xpose.msk.msra.mxu0 %vm637_vm2, %v968_v14  ;;  %1989 = vmatprep.mubr.msk.f32.mxu0 %vm2210_vm0, %v2209_v0  ;;  %v1401_v14 = vld [vmem:[#allocation2 + $0x8] sm:$0xff] }
 0x174   : > { %1997 = vmatprep.subr.mxu0 %v2209_v0  ;;  %v1133_v16 = vpop.permute.xlu1 %1132 }
 0x176   : > { %1990 = vmatmul.mubr.msk.f32.vlgmr.msra.gmra.mxu0 %vm637_vm2, %v966_v15  ;;  %v1131_v17 = vpop.permute.xlu0 %1130 }
 0x177   : > { %1998 = vmatpush3.xpose.msk.msra.mxu0 %vm637_vm2, %v1133_v16  ;;  %1999 = vmatprep.mubr.msk.f32.mxu0 %vm2210_vm0, %v2209_v0 }
 0x178   : > { %2007 = vmatprep.subr.mxu0 %v2209_v0 }
 0x17a   : > { %2000 = vmatmul.mubr.msk.f32.vlgmr.msra.gmra.mxu0 %vm637_vm2, %v1131_v17 }
 0x17b   : > { %2015 = vmatprep.mubr.msk.f32.mxu0 %vm2210_vm0, %v2209_v0  ;;  %2008 = vmatpush3.msra.mxu0 %v1315_v3  ;;  %v1672_v3 = vld [vmem:[%s2589_s12 + $0x8] sm:$0xff] }
 0x17c   : > { %2009 = vmatprep.subr.mxu0 %v2209_v0 }
 0x17d   : > { %2010 = vmatpush3.msra.mxu0 %v1314_v9 }
 0x17e   : > { %2011 = vmatprep.subr.mxu0 %v2209_v0 }
 0x17f   : > { %2012 = vmatpush3.msra.mxu0 %v1313_v10 }
 0x180   : > { %2013 = vmatprep.subr.mxu0 %v2209_v0 }
 0x181   : > { %2014 = vmatpush3.msra.mxu0 %v1312_v11  ;;  %v1900_v11 = vld [vmem:[%s2590_s13] ss:$0 sm:$0xff] }
 0x182   : > { %2029 = vmatprep.subr.mxu0 %v2209_v0 }
 0x22e   : > { %v709_v18 = vpop.f32.mrf.mxu1 }
 0x22f   : > { %v713_v19 = vsel %vm637_vm2, %v709_v18, -inf }
 0x230   : > { %714 = vmax.xlane.f32.xlu1 %v713_v19  ;;  %v1971_v20 = vpop.f32.mrf.mxu1 }
 0x232   : > { %v874_v21 = vpop.f32.mrf.mxu0 }
 0x233   : > { %v878_v22 = vsel %vm637_vm2, %v874_v21, -inf }
 0x234   : > { %879 = vmax.xlane.f32.xlu0 %v878_v22  ;;  %v1981_v23 = vpop.f32.mrf.mxu0 }
 0x236   : > { %v1039_v24 = vpop.f32.mrf.mxu0 }
 0x237   : > { %v1043_v25 = vsel %vm637_vm2, %v1039_v24, -inf }
 0x238   : > { %1044 = vmax.xlane.f32.xlu0 %v1043_v25  ;;  %v1991_v26 = vpop.f32.mrf.mxu0 }
 0x239   : > { %v1398_v26 = vld [vmem:[%s2582_s5 + $0x10] sm:$0xff] }
 0x23a   : > { %v1204_v27 = vpop.f32.mrf.mxu0 }
 0x23b   : > { %v1208_v28 = vsel %vm637_vm2, %v1204_v27, -inf }
 0x23c   : > { %v2001_v29 = vpop.f32.mrf.mxu0  ;;  %1209 = vmax.xlane.f32.xlu1 %v1208_v28  ;;  %v1400_v28 = vld [vmem:[#allocation2] sm:$0xff] }
 0x23d   : > { %v1396_v29 = vld [vmem:[%s2582_s5] sm:$0xff] }
 0x24d   : > { %889 = vrot.lane.b32.xlu1 %v2402_v8, %s2218_s19 }
 0x2b9   : > { %v715_v30 = vpop.xlane.xlu1 %714 }
 0x2ba   : > { %v716_v31 = vsub.f32 %v709_v18, %v715_v30  ;;  %v1891_v30 = vld [vmem:[%s2581_s4] ss:$0 sm:$0xff] }
 0x2bc   : > { %v717_v32 = vmul.f32 1.442695, %v716_v31 }
 0x2bd   : > { %v880_v33 = vpop.xlane.xlu0 %879 }
 0x2be   : > { %2117 = vpow2.f32 %v717_v32  ;;  %v881_v34 = vsub.f32 %v874_v21, %v880_v33 }
 0x2c0   : > { %v882_v35 = vmul.f32 1.442695, %v881_v34 }
 0x2c1   : > { %v1045_v45 = vpop.xlane.xlu0 %1044 }
 0x2c2   : > { %2119 = vpow2.f32 %v882_v35  ;;  %v1046_v46 = vsub.f32 %v1039_v24, %v1045_v45  ;;  %v1399_v24 = vld [vmem:[%s2582_s5 + $0x18] sm:$0xff] }
 0x2c4   : > { %v1047_v47 = vmul.f32 1.442695, %v1046_v46 }
 0x2c5   : > { %v1210_v36 = vpop.xlane.xlu1 %1209 }
 0x2c6   : > { %v1211_v37 = vsub.f32 %v1204_v27, %v1210_v36  ;;  %v1397_v27 = vld [vmem:[%s2582_s5 + $0x8] sm:$0xff] }
 0x2c8   : > { %v1212_v38 = vmul.f32 1.442695, %v1211_v37  ;;  %v1895_v37 = vld [vmem:[%s2584_s7] ss:$0 sm:$0xff] }
 0x2c9   : > { %v890_v50 = vpop.permute.xlu1 %889 }
 0x2ca   : > { %2121 = vpow2.f32 %v1212_v38 }
 0x2cb   : > { %v2118_v39 = vpop.eup %2117  ;;  %2123 = vpow2.f32 %v1047_v47 }
 0x2cc   : > { %v719_v40 = vsel %vm637_vm2, %v2118_v39, 0.0 }
 0x2cd   : > { %720 = vadd.xlane.f32.xlu0 %v719_v40 }
 0x2cf   : > { %v2120_v41 = vpop.eup %2119 }
 0x2d0   : > { %v884_v42 = vsel %vm637_vm2, %v2120_v41, 0.0 }
 0x2d1   : > { %885 = vadd.xlane.f32.xlu1 %v884_v42 }
 0x2d7   : > { %v2122_v43 = vpop.eup %2121 }
 0x2d8   : > { %v1214_v44 = vsel %vm637_vm2, %v2122_v43, 0.0  ;;  %v2124_v48 = vpop.eup %2123 }
 0x2d9   : > { %1215 = vadd.xlane.f32.xlu1 %v1214_v44  ;;  %v1049_v49 = vsel %vm637_vm2, %v2124_v48, 0.0 }
 0x2e3   : > { %724 = vrot.lane.b32.xlu0 %v2402_v8, %s2219_s20  ;;  %s2223_s20 = smov 16  }
 0x2ea   : > { %1054 = vrot.lane.b32.xlu1 %v2402_v8, %s2220_s23  ;;  %s2224_s23 = smov 24  }
 0x302   : > { %1050 = vadd.xlane.f32.xlu0 %v1049_v49  ;;  %v1588_v49 = vld [vmem:[#allocation4 + $0x10] sm:$0xff] }
 0x318   : > { %1219 = vrot.lane.b32.xlu0 %v2402_v8, %s2221_s25 }
 0x356   : > { %v721_v51 = vpop.xlane.xlu0 %720 }
 0x357   : > { %2125 = vrcp.f32 %v721_v51  ;;  %v1678_v51 = vld [vmem:[%s2589_s12 + $0x38] sm:$0xff] }
 0x35a   : > { %v725_v52 = vpop.permute.xlu0 %724  ;;  %v886_v53 = vpop.xlane.xlu1 %885 }
 0x35b   : > { %2127 = vrcp.f32 %v886_v53  ;;  %1973 = vmatpush3.msra.mxu1 %v725_v52  ;;  %v1677_v52 = vld [vmem:[%s2589_s12 + $0x30] sm:$0xff]  ;;  %v1676_v53 = vld [vmem:[%s2589_s12 + $0x28] sm:$0xff] }
 0x35c   : > { %1982 = vmatprep.subr.mxu1 %v2209_v0 }
 0x362   : > { %v1216_v55 = vpop.xlane.xlu1 %1215 }
 0x364   : > { %v2126_v54 = vpop.eup %2125 }
 0x365   : > { %v723_v56 = vmul.f32 %v2126_v54, %v2118_v39  ;;  %v1675_v54 = vld [vmem:[%s2589_s12 + $0x20] sm:$0xff] }
 0x366   : > { %v1055_v59 = vpop.permute.xlu1 %1054 }
 0x367   : > { %1975 = vmatmul.mubr.msk.f32.vlgmr.msra.gmra.mxu1 %vm637_vm2, %v723_v56 }
 0x368   : > { %v2128_v57 = vpop.eup %2127  ;;  %1983 = vmatpush3.msra.mxu1 %v890_v50  ;;  %1984 = vmatprep.mubr.msk.f32.mxu1 %vm2210_vm0, %v2209_v0  ;;  %v1587_v50 = vld [vmem:[#allocation4 + $0x8] sm:$0xff] }
 0x369   : > { %1992 = vmatprep.subr.mxu1 %v2209_v0  ;;  %v888_v58 = vmul.f32 %v2128_v57, %v2120_v41 }
 0x36b   : > { %1985 = vmatmul.mubr.msk.f32.vlgmr.msra.gmra.mxu1 %vm637_vm2, %v888_v58 }
 0x36c   : > { %1993 = vmatpush3.msra.mxu1 %v1055_v59  ;;  %1994 = vmatprep.mubr.msk.f32.mxu1 %vm2210_vm0, %v2209_v0 }
 0x36d   : > { %2002 = vmatprep.subr.mxu1 %v2209_v0 }
 0x38b   : > { %v1051_v60 = vpop.xlane.xlu0 %1050 }
 0x38c   : > { %2129 = vrcp.f32 %v1051_v60  ;;  %v1896_v60 = vld [vmem:[%s2585_s8] ss:$0 sm:$0xff] }
 0x38d   : > { %2131 = vrcp.f32 %v1216_v55  ;;  %v1674_v55 = vld [vmem:[%s2589_s12 + $0x18] sm:$0xff] }
 0x38f   : > { %v1220_v1 = vpop.permute.xlu0 %1219 }
 0x399   : > { %v2130_v61 = vpop.eup %2129 }
 0x39a   : > { %v1053_v62 = vmul.f32 %v2130_v61, %v2124_v48  ;;  %v2132_v63 = vpop.eup %2131  ;;  %v1589_v48 = vld [vmem:[#allocation4 + $0x18] sm:$0xff] }
 0x39b   : > { %v1218_v2 = vmul.f32 %v2132_v63, %v2122_v43 }
 0x39c   : > { %1995 = vmatmul.mubr.msk.f32.vlgmr.msra.gmra.mxu1 %vm637_vm2, %v1053_v62  ;;  %v1897_v62 = vld [vmem:[%s2586_s9] ss:$0 sm:$0xff] }
 0x39d   : > { %2003 = vmatpush3.msra.mxu1 %v1220_v1  ;;  %2004 = vmatprep.mubr.msk.f32.mxu1 %vm2210_vm0, %v2209_v0 }
 0x39e   : > { %2018 = vmatprep.subr.mxu1 %v2209_v0 }
 0x3a0   : > { %2005 = vmatmul.mubr.msk.f32.vlgmr.msra.gmra.mxu1 %vm637_vm2, %v1218_v2  ;;  %v1673_v2 = vld [vmem:[%s2589_s12 + $0x10] sm:$0xff] }
 0x3a1   : > { %2026 = vmatprep.mubr.msk.f32.mxu1 %vm2210_vm0, %v2209_v0  ;;  %2019 = vmatpush3.msra.mxu1 %v1403_v12 }
 0x3a2   : > { %2020 = vmatprep.subr.mxu1 %v2209_v0 }
 0x3a3   : > { %2021 = vmatpush3.msra.mxu1 %v1402_v13 }
 0x3a4   : > { %2022 = vmatprep.subr.mxu1 %v2209_v0 }
 0x3a5   : > { %2023 = vmatpush3.msra.mxu1 %v1401_v14 }
 0x3a6   : > { %2024 = vmatprep.subr.mxu1 %v2209_v0 }
 0x3a7   : > { %2025 = vmatpush3.msra.mxu1 %v1400_v28 }
 0x3a8   : > { %2027 = vmatmul.mubr.msk.f32.vlgmr.msra.gmra.mxu1 %vm559_vm1, %v2391_v5  ;;  %2040 = vmatprep.subr.mxu1 %v2209_v0 }
 0x3a9   : > { %2048 = vmatprep.mubr.msk.f32.mxu1 %vm2210_vm0, %v2209_v0  ;;  %2041 = vmatpush3.msra.mxu1 %v1589_v48 }
 0x3aa   : > { %2042 = vmatprep.subr.mxu1 %v2209_v0 }
 0x3ab   : > { %2043 = vmatpush3.msra.mxu1 %v1588_v49 }
 0x3ac   : > { %2044 = vmatprep.subr.mxu1 %v2209_v0 }
 0x3ad   : > { %2045 = vmatpush3.msra.mxu1 %v1587_v50 }
 0x3ae   : > { %2046 = vmatprep.subr.mxu1 %v2209_v0 }
 0x427   : > { %v796_v4 = vpop.f32.mrf.mxu1 }
 0x429   : > { %v1976_v6 = vpop.f32.mrf.mxu1 }
 0x42a   : > { %v1898_v6 = vld [vmem:[%s2588_s11] ss:$0 sm:$0xff] }
 0x42b   : > { %v961_v7 = vpop.f32.mrf.mxu1 }
 0x42c   : > { %1296 = vrot.lane.b32.xlu1 %v961_v7, %s2222_s28 }
 0x42d   : > { %v1986_v8 = vpop.f32.mrf.mxu1 }
 0x45c   : > { %v1126_v15 = vpop.f32.mrf.mxu1 }
 0x45d   : > { %1300 = vrot.lane.b32.xlu0 %v1126_v15, %s2223_s20 }
 0x45e   : > { %v1996_v16 = vpop.f32.mrf.mxu1 }
 0x460   : > { %v1291_v17 = vpop.f32.mrf.mxu1 }
 0x461   : > { %1304 = vrot.lane.b32.xlu1 %v1291_v17, %s2224_s23 }
 0x462   : > { %v2006_v18 = vpop.f32.mrf.mxu1 }
 0x468   : > { %v1470_v34 = vpop.f32.mrf.mxu1 }
 0x46a   : > { %v2028_v35 = vpop.f32.mrf.mxu1 }
 0x49e   : > { %v1297_v19 = vpop.permute.xlu1 %1296 }
 0x49f   : > { %v1307_v21 = vsel %vm637_vm2, %v796_v4, %v1297_v19  ;;  %v1671_v4 = vld [vmem:[%s2589_s12] sm:$0xff] }
 0x4cf   : > { %v1301_v20 = vpop.permute.xlu0 %1300 }
 0x4d0   : > { %v1309_v22 = vsel %vm1308_vm3, %v1307_v21, %v1301_v20 }
 0x4d3   : > { %v1305_v23 = vpop.permute.xlu1 %1304 }
 0x4d4   : > { %v1311_v25 = vsel %vm1310_vm4, %v1309_v22, %v1305_v23 }
 0x4d5   : > { %2016 = vmatmul.mubr.msk.f32.vlgmr.msra.gmra.mxu0 %vm559_vm1, %v1311_v25  ;;  %v1902_v25 = vld [vmem:[%s2591_s14] ss:$0 sm:$0xff] }
 0x4d6   : > { %2030 = vmatpush3.msra.mxu0 %v1399_v24  ;;  %2037 = vmatprep.mubr.msk.f32.mxu0 %vm2210_vm0, %v2209_v0 }
 0x4d7   : > { %2031 = vmatprep.subr.mxu0 %v2209_v0 }
 0x4d8   : > { %2032 = vmatpush3.msra.mxu0 %v1398_v26 }
 0x4d9   : > { %2033 = vmatprep.subr.mxu0 %v2209_v0 }
 0x4da   : > { %2034 = vmatpush3.msra.mxu0 %v1397_v27  ;;  %v1903_v27 = vld [vmem:[%s2592_s15] ss:$0 sm:$0xff] }
 0x4db   : > { %2035 = vmatprep.subr.mxu0 %v2209_v0 }
 0x4dc   : > { %2036 = vmatpush3.msra.mxu0 %v1396_v29 }
 0x4dd   : > { %2051 = vmatprep.subr.mxu0 %v2209_v0 }
 0x595   : > { %v1392_v31 = vpop.f32.mrf.mxu0 }
 0x596   : > { %v1393_v32 = vadd.f32 %v1891_v30, %v1392_v31 }
 0x597   : > { %v2017_v33 = vpop.f32.mrf.mxu0 }
 0x598   : > { %2038 = vmatmul.mubr.msk.f32.vlgmr.msra.gmra.mxu0 %vm559_vm1, %v1393_v32 }
 0x599   : > { %2067 = vmatprep.mubr.msk.f32.mxu0 %vm2210_vm0, %v2209_v0  ;;  %2052 = vmatpush3.msra.mxu0 %v1678_v51 }
 0x59a   : > { %2053 = vmatprep.subr.mxu0 %v2209_v0 }
 0x59b   : > { %2054 = vmatpush3.msra.mxu0 %v1677_v52 }
 0x59c   : > { %2055 = vmatprep.subr.mxu0 %v2209_v0 }
 0x59d   : > { %2056 = vmatpush3.msra.mxu0 %v1676_v53 }
 0x59e   : > { %2057 = vmatprep.subr.mxu0 %v2209_v0 }
 0x59f   : > { %2058 = vmatpush3.msra.mxu0 %v1675_v54 }
 0x5a0   : > { %2059 = vmatprep.subr.mxu0 %v2209_v0 }
 0x5a1   : > { %2060 = vmatpush3.msra.mxu0 %v1674_v55 }
 0x5a2   : > { %2061 = vmatprep.subr.mxu0 %v2209_v0 }
 0x5a3   : > { %2062 = vmatpush3.msra.mxu0 %v1673_v2 }
 0x5a4   : > { %2063 = vmatprep.subr.mxu0 %v2209_v0 }
 0x5a5   : > { %2064 = vmatpush3.msra.mxu0 %v1672_v3 }
 0x5a6   : > { %2065 = vmatprep.subr.mxu0 %v2209_v0 }
 0x5a7   : > { %2066 = vmatpush3.msra.mxu0 %v1671_v4 }
 0x658   : > { %v1543_v36 = vpop.f32.mrf.mxu0 }
 0x659   : > { %v1544_v38 = vadd.f32 %v1543_v36, %v1470_v34 }
 0x65a   : > { %v2039_v39 = vpop.f32.mrf.mxu0 }
 0x65b   : > { %v1554_v40 = vadd.f32 %v1895_v37, %v1544_v38 }
 0x65d   : > { %v1555_v41 = vadd.f32 %v1554_v40, %v2391_v5  ;;  %v1586_v5 = vld [vmem:[#allocation4] sm:$0xff] }
 0x65e   : > { %2047 = vmatpush3.msra.mxu1 %v1586_v5 }
 0x65f   : > { %v1556_v42 = vsel %vm559_vm1, %v1555_v41, 0.0 }
 0x660   : > { %1557 = vadd.xlane.f32.xlu0 %v1556_v42 }
 0x6e9   : > { %v1558_v43 = vpop.xlane.xlu0 %1557 }
 0x6ea   : > { %v1560_v44 = vmul.f32 0.03125, %v1558_v43 }
 0x6ec   : > { %v1561_v45 = vsub.f32 %v1555_v41, %v1560_v44 }
 0x6ee   : > { %v1562_v46 = vmul.f32 %v1561_v45, %v1561_v45 }
 0x6f0   : > { %v1563_v47 = vsel %vm559_vm1, %v1562_v46, 0.0 }
 0x6f1   : > { %1564 = vadd.xlane.f32.xlu1 %v1563_v47 }
 0x77a   : > { %v1565_v56 = vpop.xlane.xlu1 %1564 }
 0x77b   : > { %v1566_v57 = vmul.f32 0.03125, %v1565_v56 }
 0x77d   : > { %v1567_v58 = vadd.f32 1e-05, %v1566_v57 }
 0x77f   : > { %2133 = vrsqrt.f32 %v1567_v58 }
 0x78c   : > { %v2134_v59 = vpop.eup %2133 }
 0x78d   : > { %v1569_v61 = vmul.f32 %v2134_v59, %v1561_v45 }
 0x78f   : > { %v1577_v63 = vmul.f32 %v1896_v60, %v1569_v61 }
 0x791   : > { %v1585_v1 = vadd.f32 %v1897_v62, %v1577_v63 }
 0x793   : > { %2049 = vmatmul.mubr.msk.f32.vlgmr.msra.gmra.mxu1 %vm559_vm1, %v1585_v1 }
 0x853   : > { %v1666_v7 = vpop.f32.mrf.mxu1 }
 0x854   : > { %v1667_v8 = vadd.f32 %v1898_v6, %v1666_v7 }
 0x855   : > { %v2050_v9 = vpop.f32.mrf.mxu1 }
 0x856   : > { %v1670_v10 = vmax.f32 %v1667_v8, 0.0 }
 0x858   : > { %2068 = vmatmul.mubr.msk.f32.vlgmr.msra.gmra.mxu0 %vm1686_vm5, %v1670_v10 }
 0x918   : > { %v1756_v12 = vpop.f32.mrf.mxu0 }
 0x919   : > { %v1757_v13 = vadd.f32 %v1900_v11, %v1756_v12 }
 0x91a   : > { %v2069_v14 = vpop.f32.mrf.mxu0 }
 0x91b   : > { %v1760_v15 = vadd.f32 %v1757_v13, %v1585_v1 }
 0x91d   : > { %v1761_v0 = vsel %vm559_vm1, %v1760_v15, 0.0 }
 0x91e   : > { %1762 = vadd.xlane.f32.xlu0 %v1761_v0 }
 0x9a7   : > { %v1763_v16 = vpop.xlane.xlu0 %1762 }
 0x9a8   : > { %v1764_v17 = vmul.f32 0.03125, %v1763_v16 }
 0x9aa   : > { %v1765_v18 = vsub.f32 %v1760_v15, %v1764_v17 }
 0x9ac   : > { %v1766_v19 = vmul.f32 %v1765_v18, %v1765_v18 }
 0x9ae   : > { %v1767_v20 = vsel %vm559_vm1, %v1766_v19, 0.0 }
 0x9af   : > { %1768 = vadd.xlane.f32.xlu0 %v1767_v20 }
 0xa38   : > { %v1769_v21 = vpop.xlane.xlu0 %1768 }
 0xa39   : > { %v1770_v22 = vmul.f32 0.03125, %v1769_v21 }
 0xa3b   : > { %v1771_v23 = vadd.f32 1e-05, %v1770_v22 }
 0xa3d   : > { %2135 = vrsqrt.f32 %v1771_v23 }
 0xa4a   : > { %v2136_v24 = vpop.eup %2135 }
 0xa4b   : > { %v1773_v26 = vmul.f32 %v2136_v24, %v1765_v18 }
 0xa4d   : > { %v1781_v28 = vmul.f32 %v1902_v25, %v1773_v26 }
 0xa4f   : > { %v1789_v29 = vadd.f32 %v1903_v27, %v1781_v28 }
 0xa51   : > { %1790 = vst.msk [vmem:[%s546_s0] sm:$0xff] %vm559_vm1, %v1789_v29 }
 0xa52 PF: > { %s28_s21 = sadd.s32 1, %s2203_s21  }
 0xa53   : > { %p25_p2 = scmp.ge.s32.totalorder %s28_s21, 4  }
 0xa55   :  { %27 = sbr.rel (!%p25_p2) target bundleno = 4 (0x4), region = 123 }
 0xa5a   :  { %1810 = vsyncpa [#allocation3], 1 }
 0xa5b   :  { %1812 = vsyncpa [#allocation3 + $0x1], 1 }
 0xa5c   :  { %1813 = vsyncpa [#allocation5], 1 }

</bundles_post_ra>
